<compile_context>
chip_gen: v5e
topology: v5e:2x2
jax: 0.10.0
libtpu: 0.0.40
codegen_flags: <defaults>
</compile_context>

<pallas_src>
import functools

import numpy as np
import jax
import jax.numpy as jnp
from jax import lax
from jax.experimental import pallas as pl
from jax.experimental.pallas import tpu as pltpu


def _round_up(x, m):
    return -(-x // m) * m


def _vmem_capacity_bytes():
    try:
        info = pltpu.get_tpu_info()
        cap = getattr(info, "vmem_capacity_bytes", None)
        if cap:
            return int(cap)
    except Exception:
        pass
    return 64 * 1024 * 1024  # conservative fallback (v7x per-core VMEM)


# ----------------------------------------------------------------------------
# Kernel
# ----------------------------------------------------------------------------
def _tcn_block_kernel(*refs, k, d, pad, L_in, L_mid, L_out, Bt, Sx, Sh, halo,
                      C_in, C1, has_res):
    if has_res:
        (x_ref, w1_ref, b1_ref, w2_ref, b2_ref, wr_ref, br_ref,
         out_ref, xpad_ref, hpad_ref, res_ref) = refs
    else:
        (x_ref, w1_ref, b1_ref, w2_ref, b2_ref,
         out_ref, xpad_ref, hpad_ref, res_ref) = refs
        wr_ref = br_ref = None

    # Residual zero-extension tail: columns [L_in, L_out) are always zero.
    if L_out > L_in:
        res_ref[:, L_in:] = jnp.zeros((C1, L_out - L_in), jnp.float32)

    # Hoisted zero tiles for the (small, pad-wide) halo bands.
    if pad:
        zx = jnp.zeros((C_in, pad), jnp.bfloat16)
        zh = jnp.zeros((C1, pad), jnp.bfloat16)

    for b in range(Bt):
        bx = b * Sx + halo          # 128-aligned start of this batch's x band
        bh = b * Sh + halo          # 128-aligned start of this batch's h band

        # ---- stage x (bf16) with zero halos; aligned lane-dense data store --
        if pad:
            xpad_ref[:, bx - pad:bx] = zx
            xpad_ref[:, bx + L_in:bx + L_in + pad] = zx
        xpad_ref[:, bx:bx + L_in] = x_ref[b].astype(jnp.bfloat16)

        # ---- conv1 (dilated): k accumulated bf16 MXU matmuls, f32 acc -------
        acc = None
        for t in range(k):
            s = bx - pad + t * d
            m = jnp.dot(w1_ref[t], xpad_ref[:, s:s + L_mid],
                        preferred_element_type=jnp.float32)
            acc = m if acc is None else acc + m
        h = jnp.maximum(acc + b1_ref[...], 0.0)          # (C1, L_mid) f32
        # dropout == identity (eval mode)

        # ---- stage h (bf16) with zero halos ---------------------------------
        if pad:
            hpad_ref[:, bh - pad:bh] = zh
            hpad_ref[:, bh + L_mid:bh + L_mid + pad] = zh
        hpad_ref[:, bh:bh + L_mid] = h.astype(jnp.bfloat16)

        # ---- conv2 (dilated): k accumulated bf16 MXU matmuls, f32 acc -------
        acc = None
        for t in range(k):
            s = bh - pad + t * d
            m = jnp.dot(w2_ref[t], hpad_ref[:, s:s + L_out],
                        preferred_element_type=jnp.float32)
            acc = m if acc is None else acc + m
        o = jnp.maximum(acc + b2_ref[...], 0.0)          # (C1, L_out) f32

        # ---- residual, zero-extended to L_out through the f32 scratch -------
        if has_res:
            r = jnp.dot(wr_ref[...], xpad_ref[:, bx:bx + L_in],
                        preferred_element_type=jnp.float32) + br_ref[...]
        else:
            r = x_ref[b]              # identity skip (C_in == C1), exact f32
        res_ref[:, :L_in] = r

        # Single full-width (lane-dense) store of this batch's output.
        out_ref[b] = o + res_ref[...]


# ----------------------------------------------------------------------------
# Wrapper
# ----------------------------------------------------------------------------
def _pick_batch_tile(B, bytes_fn, budget):
    """Largest Bt dividing B that fits the VMEM budget, preferring >= 2 grid
    steps when B >= 2 so a 'parallel' batch axis can shard across both v7x
    TensorCores (harmless on single-core chips)."""
    cands = [bt for bt in range(1, B + 1) if B % bt == 0]
    pref = [bt for bt in cands if bt <= B // 2] if B >= 2 else cands
    if not pref:
        pref = cands
    fitting = [bt for bt in pref if bytes_fn(bt) <= budget]
    return max(fitting) if fitting else 1


def tcn_block(x, w1, b1, w2, b2, wr=None, br=None, *, kernel_size, dilation):
    """Pallas forward of PyTorch TCNBlock (eval mode: dropout == identity).

    x : (B, C_in, L_in) f32
    w1: (C_out, C_in, k), b1: (C_out,)      -- conv1 (dilated)
    w2: (C_out, C_out, k), b2: (C_out,)     -- conv2 (dilated)
    wr: (C_out, C_in, 1) or None, br: (C_out,) or None -- 1x1 residual conv
    returns (B, C_out, L_in + 2*(k-1)*dilation)  (f32; matmuls use bf16
    operands with f32 accumulation)
    """
    B, C_in, L_in = x.shape
    C1 = w1.shape[0]
    k, d = kernel_size, dilation
    pad = (k - 1) * d
    L_mid = L_in + pad
    L_out = L_in + 2 * pad
    has_res = wr is not None
    if not has_res:
        assert C_in == C1, "identity skip requires input_size == output_size"

    # Per-batch column strides of the zero-haloed scratch bands (128-aligned
    # data start, 128-multiple stride -> lane-dense staging stores).
    halo = _round_up(pad, 128) if pad else 0
    Sx = halo + _round_up(L_in + pad, 128)
    Sh = halo + _round_up(L_mid + pad, 128)

    # Per-tap weight stacks, bf16 operands (f32 accumulation in the kernel).
    w1s = jnp.transpose(w1, (2, 0, 1)).astype(jnp.bfloat16)     # (k, C1, C_in)
    w2s = jnp.transpose(w2, (2, 0, 1)).astype(jnp.bfloat16)     # (k, C1, C1)
    b1c = b1.reshape(C1, 1).astype(jnp.float32)
    b2c = b2.reshape(C1, 1).astype(jnp.float32)

    # Generation-aware VMEM budgeting.
    cap = _vmem_capacity_bytes()
    budget = cap // 2

    def tile_bytes(bt):
        scratch = 2 * C_in * bt * Sx + 2 * C1 * bt * Sh + 4 * C1 * L_out
        blocks = 2 * 4 * bt * (C_in * L_in + C1 * L_out)   # dbl-buffered I/O
        weights = 2 * (2 * k * C1 * (C_in + C1) + 4 * 2 * C1)
        if has_res:
            weights += 2 * (2 * C1 * C_in + 4 * C1)
        return scratch + blocks + weights

    Bt = _pick_batch_tile(B, tile_bytes, budget)
    assert B % Bt == 0
    grid = (B // Bt,)
    vmem_limit = int(min(int(0.9 * cap),
                         max(32 * 1024 * 1024, 2 * tile_bytes(Bt))))

    kernel = functools.partial(
        _tcn_block_kernel, k=k, d=d, pad=pad, L_in=L_in, L_mid=L_mid,
        L_out=L_out, Bt=Bt, Sx=Sx, Sh=Sh, halo=halo, C_in=C_in, C1=C1,
        has_res=has_res)

    in_specs = [
        pl.BlockSpec((Bt, C_in, L_in), lambda i: (i, 0, 0)),
        pl.BlockSpec((k, C1, C_in), lambda i: (0, 0, 0)),
        pl.BlockSpec((C1, 1), lambda i: (0, 0)),
        pl.BlockSpec((k, C1, C1), lambda i: (0, 0, 0)),
        pl.BlockSpec((C1, 1), lambda i: (0, 0)),
    ]
    args = [x, w1s, b1c, w2s, b2c]
    if has_res:
        in_specs += [pl.BlockSpec((C1, C_in), lambda i: (0, 0)),
                     pl.BlockSpec((C1, 1), lambda i: (0, 0))]
        args += [wr.reshape(C1, C_in).astype(jnp.bfloat16),
                 br.reshape(C1, 1).astype(jnp.float32)]

    flops = 2 * B * (k * C_in * C1 * L_mid + k * C1 * C1 * L_out
                     + (C_in * C1 * L_in if has_res else 0))
    bytes_accessed = (4 * B * (C_in * L_in + C1 * L_out)
                      + 2 * k * C1 * (C_in + C1) + 4 * 2 * C1
                      + (2 * C1 * C_in + 4 * C1 if has_res else 0))

    return pl.pallas_call(
        kernel,
        out_shape=jax.ShapeDtypeStruct((B, C1, L_out), jnp.float32),
        grid_spec=pltpu.PrefetchScalarGridSpec(
            num_scalar_prefetch=0,
            grid=grid,
            in_specs=in_specs,
            out_specs=pl.BlockSpec((Bt, C1, L_out), lambda i: (i, 0, 0)),
            scratch_shapes=[pltpu.VMEM((C_in, Bt * Sx), jnp.bfloat16),
                            pltpu.VMEM((C1, Bt * Sh), jnp.bfloat16),
                            pltpu.VMEM((C1, L_out), jnp.float32)],
        ),
        compiler_params=pltpu.CompilerParams(
            dimension_semantics=("parallel",),
            vmem_limit_bytes=vmem_limit),
        cost_estimate=pl.CostEstimate(flops=flops, transcendentals=0,
                                      bytes_accessed=bytes_accessed),
    )(*args)


# ----------------------------------------------------------------------------
# Pure-JAX reference (PyTorch Conv1d semantics, eval mode)
# ----------------------------------------------------------------------------
def ref_tcn_block(x, w1, b1, w2, b2, wr=None, br=None, *, kernel_size,
                  dilation):
    k, d = kernel_size, dilation
    pad = (k - 1) * d
    out = lax.conv_general_dilated(x, w1, (1,), [(pad, pad)],
                                   rhs_dilation=(d,),
                                   dimension_numbers=("NCH", "OIH", "NCH"))
    out = jnp.maximum(out + b1[None, :, None], 0.0)
    out = lax.conv_general_dilated(out, w2, (1,), [(pad, pad)],
                                   rhs_dilation=(d,),
                                   dimension_numbers=("NCH", "OIH", "NCH"))
    out = jnp.maximum(out + b2[None, :, None], 0.0)
    if wr is not None:
        xres = jnp.einsum("oc,bcl->bol", wr.reshape(wr.shape[0], -1), x)
        xres = xres + br[None, :, None]
    else:
        xres = x
    xres = jnp.pad(xres, ((0, 0), (0, 0), (0, out.shape[2] - xres.shape[2])))
    return xres + out


# ----------------------------------------------------------------------------
# Self-test
# ----------------------------------------------------------------------------
if __name__ == "__main__":
    key = jax.random.PRNGKey(0)

    def make_params(key, c_in, c_out, k):
        ks = jax.random.split(key, 6)
        w1 = jax.random.normal(ks[0], (c_out, c_in, k), jnp.float32) * 0.2
        b1 = jax.random.normal(ks[1], (c_out,), jnp.float32) * 0.1
        w2 = jax.random.normal(ks[2], (c_out, c_out, k), jnp.float32) * 0.2
        b2 = jax.random.normal(ks[3], (c_out,), jnp.float32) * 0.1
        if c_in != c_out:
            wr = jax.random.normal(ks[4], (c_out, c_in, 1), jnp.float32) * 0.2
            br = jax.random.normal(ks[5], (c_out,), jnp.float32) * 0.1
        else:
            wr = br = None            # torch residual=None -> identity skip
        return w1, b1, w2, b2, wr, br

    # bf16 matmul operands (f32 accumulation) -> relaxed tolerance vs f32 ref.
    RTOL = ATOL = 5e-2

    # Case 1: projection residual (input_size != output_size), dilation 2.
    B, C_in, L, C_out, k, d = 2, 4, 16, 8, 3, 2
    key, kx, kp = jax.random.split(key, 3)
    x = jax.random.normal(kx, (B, C_in, L), jnp.float32)
    w1, b1, w2, b2, wr, br = make_params(kp, C_in, C_out, k)
    out = jax.block_until_ready(
        tcn_block(x, w1, b1, w2, b2, wr, br, kernel_size=k, dilation=d))
    ref = ref_tcn_block(x, w1, b1, w2, b2, wr, br, kernel_size=k, dilation=d)
    np.testing.assert_allclose(np.asarray(out), np.asarray(ref),
                               rtol=RTOL, atol=ATOL)

    # Case 2: identity skip (input_size == output_size), dilation 1.
    B2, C2, L2, k2, d2 = 2, 8, 16, 3, 1
    key, kx2, kp2 = jax.random.split(key, 3)
    x2 = jax.random.normal(kx2, (B2, C2, L2), jnp.float32)
    w1b, b1b, w2b, b2b, wrb, brb = make_params(kp2, C2, C2, k2)
    out2 = jax.block_until_ready(
        tcn_block(x2, w1b, b1b, w2b, b2b, wrb, brb, kernel_size=k2,
                  dilation=d2))
    ref2 = ref_tcn_block(x2, w1b, b1b, w2b, b2b, wrb, brb, kernel_size=k2,
                         dilation=d2)
    np.testing.assert_allclose(np.asarray(out2), np.asarray(ref2),
                               rtol=RTOL, atol=ATOL)

    print("KERNEL_OK")
</pallas_src>

<mosaic_0001>
module attributes {stable_mosaic.version = 11 : i64} {
  func.func @_tcn_block_kernel(%arg0: i32, %arg1: memref<1x4x16xf32, #tpu.memory_space<vmem>>, %arg2: memref<3x8x4xbf16, #tpu.memory_space<vmem>>, %arg3: memref<8x1xf32, #tpu.memory_space<vmem>>, %arg4: memref<3x8x8xbf16, #tpu.memory_space<vmem>>, %arg5: memref<8x1xf32, #tpu.memory_space<vmem>>, %arg6: memref<8x4xbf16, #tpu.memory_space<vmem>>, %arg7: memref<8x1xf32, #tpu.memory_space<vmem>>, %arg8: memref<1x8x24xf32, #tpu.memory_space<vmem>>, %arg9: memref<4x256xbf16, #tpu.memory_space<vmem>>, %arg10: memref<8x256xbf16, #tpu.memory_space<vmem>>, %arg11: memref<8x24xf32, #tpu.memory_space<vmem>>) attributes {dimension_semantics = [#tpu.dimension_semantics<parallel>], iteration_bounds = array<i64: 2>, scalar_prefetch = 0 : i64, scratch_operands = 3 : i64, tpu.core_type = #tpu.core_type<tc>, window_params = [{transform_indices = @transform_0, window_bounds = array<i64: 1, 4, 16>}, {pipeline_mode = #tpu.pipeline_mode<synchronous>, transform_indices = @transform_1, window_bounds = array<i64: 3, 8, 4>}, {pipeline_mode = #tpu.pipeline_mode<synchronous>, transform_indices = @transform_2, window_bounds = array<i64: 8, 1>}, {pipeline_mode = #tpu.pipeline_mode<synchronous>, transform_indices = @transform_3, window_bounds = array<i64: 3, 8, 8>}, {pipeline_mode = #tpu.pipeline_mode<synchronous>, transform_indices = @transform_4, window_bounds = array<i64: 8, 1>}, {pipeline_mode = #tpu.pipeline_mode<synchronous>, transform_indices = @transform_5, window_bounds = array<i64: 8, 4>}, {pipeline_mode = #tpu.pipeline_mode<synchronous>, transform_indices = @transform_6, window_bounds = array<i64: 8, 1>}, {transform_indices = @transform_7, window_bounds = array<i64: 1, 8, 24>}]} {
    %cst = arith.constant 0.000000e+00 : f32
    %0 = vector.broadcast %cst : f32 to vector<8x8xf32>
    %c0 = arith.constant 0 : index
    %c16 = arith.constant 16 : index
    %1 = vector.load %arg11[%c0, %c16] : memref<8x24xf32, #tpu.memory_space<vmem>>, vector<8x8xf32>
    tpu.vector_store %arg11[%c0, %c16], %0 {strides = array<i32>} : memref<8x24xf32, #tpu.memory_space<vmem>>, vector<8x8xf32>,
    %cst_0 = arith.constant 0.000000e+00 : bf16
    %2 = vector.broadcast %cst_0 : bf16 to vector<4x4xbf16>
    %cst_1 = arith.constant 0.000000e+00 : bf16
    %3 = vector.broadcast %cst_1 : bf16 to vector<8x4xbf16>
    %c0_2 = arith.constant 0 : index
    %c124 = arith.constant 124 : index
    %4 = vector.load %arg9[%c0_2, %c124] : memref<4x256xbf16, #tpu.memory_space<vmem>>, vector<4x4xbf16>
    tpu.vector_store %arg9[%c0_2, %c124], %2 {strides = array<i32>} : memref<4x256xbf16, #tpu.memory_space<vmem>>, vector<4x4xbf16>,
    %c0_3 = arith.constant 0 : index
    %c144 = arith.constant 144 : index
    %5 = vector.load %arg9[%c0_3, %c144] : memref<4x256xbf16, #tpu.memory_space<vmem>>, vector<4x4xbf16>
    tpu.vector_store %arg9[%c0_3, %c144], %2 {strides = array<i32>} : memref<4x256xbf16, #tpu.memory_space<vmem>>, vector<4x4xbf16>,
    %c0_4 = arith.constant 0 : index
    %c0_5 = arith.constant 0 : index
    %c0_6 = arith.constant 0 : index
    %6 = vector.load %arg1[%c0_4, %c0_5, %c0_6] : memref<1x4x16xf32, #tpu.memory_space<vmem>>, vector<1x4x16xf32>
    %7 = vector.shape_cast %6 : vector<1x4x16xf32> to vector<4x16xf32>
    %8 = arith.truncf %7 : vector<4x16xf32> to vector<4x16xbf16>
    %c0_7 = arith.constant 0 : index
    %c128 = arith.constant 128 : index
    %9 = vector.load %arg9[%c0_7, %c128] : memref<4x256xbf16, #tpu.memory_space<vmem>>, vector<4x16xbf16>
    tpu.vector_store %arg9[%c0_7, %c128], %8 {strides = array<i32>} : memref<4x256xbf16, #tpu.memory_space<vmem>>, vector<4x16xbf16>,
    %c0_8 = arith.constant 0 : index
    %c0_9 = arith.constant 0 : index
    %c0_10 = arith.constant 0 : index
    %10 = vector.load %arg2[%c0_8, %c0_9, %c0_10] : memref<3x8x4xbf16, #tpu.memory_space<vmem>>, vector<1x8x4xbf16>
    %11 = vector.shape_cast %10 : vector<1x8x4xbf16> to vector<8x4xbf16>
    %c0_11 = arith.constant 0 : index
    %c124_12 = arith.constant 124 : index
    %12 = vector.load %arg9[%c0_11, %c124_12] : memref<4x256xbf16, #tpu.memory_space<vmem>>, vector<4x20xbf16>
    %cst_13 = arith.constant dense<0.000000e+00> : vector<8x20xf32>
    %13 = tpu.matmul %11, %12, %cst_13 {dimension_numbers = #tpu.dot_dimension_numbers<[1], [0], [0], [1], [0, 0, 1, 1], [], []>} : vector<8x4xbf16>, vector<4x20xbf16>, vector<8x20xf32> -> vector<8x20xf32>
    %c1 = arith.constant 1 : index
    %c0_14 = arith.constant 0 : index
    %c0_15 = arith.constant 0 : index
    %14 = vector.load %arg2[%c1, %c0_14, %c0_15] : memref<3x8x4xbf16, #tpu.memory_space<vmem>>, vector<1x8x4xbf16>
    %15 = vector.shape_cast %14 : vector<1x8x4xbf16> to vector<8x4xbf16>
    %c0_16 = arith.constant 0 : index
    %c126 = arith.constant 126 : index
    %16 = vector.load %arg9[%c0_16, %c126] : memref<4x256xbf16, #tpu.memory_space<vmem>>, vector<4x20xbf16>
    %cst_17 = arith.constant dense<0.000000e+00> : vector<8x20xf32>
    %17 = tpu.matmul %15, %16, %cst_17 {dimension_numbers = #tpu.dot_dimension_numbers<[1], [0], [0], [1], [0, 0, 1, 1], [], []>} : vector<8x4xbf16>, vector<4x20xbf16>, vector<8x20xf32> -> vector<8x20xf32>
    %18 = arith.addf %13, %17 : vector<8x20xf32>
    %c2 = arith.constant 2 : index
    %c0_18 = arith.constant 0 : index
    %c0_19 = arith.constant 0 : index
    %19 = vector.load %arg2[%c2, %c0_18, %c0_19] : memref<3x8x4xbf16, #tpu.memory_space<vmem>>, vector<1x8x4xbf16>
    %20 = vector.shape_cast %19 : vector<1x8x4xbf16> to vector<8x4xbf16>
    %c0_20 = arith.constant 0 : index
    %c128_21 = arith.constant 128 : index
    %21 = vector.load %arg9[%c0_20, %c128_21] : memref<4x256xbf16, #tpu.memory_space<vmem>>, vector<4x20xbf16>
    %cst_22 = arith.constant dense<0.000000e+00> : vector<8x20xf32>
    %22 = tpu.matmul %20, %21, %cst_22 {dimension_numbers = #tpu.dot_dimension_numbers<[1], [0], [0], [1], [0, 0, 1, 1], [], []>} : vector<8x4xbf16>, vector<4x20xbf16>, vector<8x20xf32> -> vector<8x20xf32>
    %23 = arith.addf %18, %22 : vector<8x20xf32>
    %c0_23 = arith.constant 0 : index
    %c0_24 = arith.constant 0 : index
    %24 = vector.load %arg3[%c0_23, %c0_24] : memref<8x1xf32, #tpu.memory_space<vmem>>, vector<8x1xf32>
    %25 = vector.broadcast %24 : vector<8x1xf32> to vector<8x20xf32>
    %26 = arith.addf %23, %25 : vector<8x20xf32>
    %cst_25 = arith.constant 0.000000e+00 : f32
    %27 = vector.broadcast %cst_25 : f32 to vector<8x20xf32>
    %28 = arith.maximumf %26, %27 : vector<8x20xf32>
    %c0_26 = arith.constant 0 : index
    %c124_27 = arith.constant 124 : index
    %29 = vector.load %arg10[%c0_26, %c124_27] : memref<8x256xbf16, #tpu.memory_space<vmem>>, vector<8x4xbf16>
    tpu.vector_store %arg10[%c0_26, %c124_27], %3 {strides = array<i32>} : memref<8x256xbf16, #tpu.memory_space<vmem>>, vector<8x4xbf16>,
    %c0_28 = arith.constant 0 : index
    %c148 = arith.constant 148 : index
    %30 = vector.load %arg10[%c0_28, %c148] : memref<8x256xbf16, #tpu.memory_space<vmem>>, vector<8x4xbf16>
    tpu.vector_store %arg10[%c0_28, %c148], %3 {strides = array<i32>} : memref<8x256xbf16, #tpu.memory_space<vmem>>, vector<8x4xbf16>,
    %31 = arith.truncf %28 : vector<8x20xf32> to vector<8x20xbf16>
    %c0_29 = arith.constant 0 : index
    %c128_30 = arith.constant 128 : index
    %32 = vector.load %arg10[%c0_29, %c128_30] : memref<8x256xbf16, #tpu.memory_space<vmem>>, vector<8x20xbf16>
    tpu.vector_store %arg10[%c0_29, %c128_30], %31 {strides = array<i32>} : memref<8x256xbf16, #tpu.memory_space<vmem>>, vector<8x20xbf16>,
    %c0_31 = arith.constant 0 : index
    %c0_32 = arith.constant 0 : index
    %c0_33 = arith.constant 0 : index
    %33 = vector.load %arg4[%c0_31, %c0_32, %c0_33] : memref<3x8x8xbf16, #tpu.memory_space<vmem>>, vector<1x8x8xbf16>
    %34 = vector.shape_cast %33 : vector<1x8x8xbf16> to vector<8x8xbf16>
    %c0_34 = arith.constant 0 : index
    %c124_35 = arith.constant 124 : index
    %35 = vector.load %arg10[%c0_34, %c124_35] : memref<8x256xbf16, #tpu.memory_space<vmem>>, vector<8x24xbf16>
    %cst_36 = arith.constant dense<0.000000e+00> : vector<8x24xf32>
    %36 = tpu.matmul %34, %35, %cst_36 {dimension_numbers = #tpu.dot_dimension_numbers<[1], [0], [0], [1], [0, 0, 1, 1], [], []>} : vector<8x8xbf16>, vector<8x24xbf16>, vector<8x24xf32> -> vector<8x24xf32>
    %c1_37 = arith.constant 1 : index
    %c0_38 = arith.constant 0 : index
    %c0_39 = arith.constant 0 : index
    %37 = vector.load %arg4[%c1_37, %c0_38, %c0_39] : memref<3x8x8xbf16, #tpu.memory_space<vmem>>, vector<1x8x8xbf16>
    %38 = vector.shape_cast %37 : vector<1x8x8xbf16> to vector<8x8xbf16>
    %c0_40 = arith.constant 0 : index
    %c126_41 = arith.constant 126 : index
    %39 = vector.load %arg10[%c0_40, %c126_41] : memref<8x256xbf16, #tpu.memory_space<vmem>>, vector<8x24xbf16>
    %cst_42 = arith.constant dense<0.000000e+00> : vector<8x24xf32>
    %40 = tpu.matmul %38, %39, %cst_42 {dimension_numbers = #tpu.dot_dimension_numbers<[1], [0], [0], [1], [0, 0, 1, 1], [], []>} : vector<8x8xbf16>, vector<8x24xbf16>, vector<8x24xf32> -> vector<8x24xf32>
    %41 = arith.addf %36, %40 : vector<8x24xf32>
    %c2_43 = arith.constant 2 : index
    %c0_44 = arith.constant 0 : index
    %c0_45 = arith.constant 0 : index
    %42 = vector.load %arg4[%c2_43, %c0_44, %c0_45] : memref<3x8x8xbf16, #tpu.memory_space<vmem>>, vector<1x8x8xbf16>
    %43 = vector.shape_cast %42 : vector<1x8x8xbf16> to vector<8x8xbf16>
    %c0_46 = arith.constant 0 : index
    %c128_47 = arith.constant 128 : index
    %44 = vector.load %arg10[%c0_46, %c128_47] : memref<8x256xbf16, #tpu.memory_space<vmem>>, vector<8x24xbf16>
    %cst_48 = arith.constant dense<0.000000e+00> : vector<8x24xf32>
    %45 = tpu.matmul %43, %44, %cst_48 {dimension_numbers = #tpu.dot_dimension_numbers<[1], [0], [0], [1], [0, 0, 1, 1], [], []>} : vector<8x8xbf16>, vector<8x24xbf16>, vector<8x24xf32> -> vector<8x24xf32>
    %46 = arith.addf %41, %45 : vector<8x24xf32>
    %c0_49 = arith.constant 0 : index
    %c0_50 = arith.constant 0 : index
    %47 = vector.load %arg5[%c0_49, %c0_50] : memref<8x1xf32, #tpu.memory_space<vmem>>, vector<8x1xf32>
    %48 = vector.broadcast %47 : vector<8x1xf32> to vector<8x24xf32>
    %49 = arith.addf %46, %48 : vector<8x24xf32>
    %cst_51 = arith.constant 0.000000e+00 : f32
    %50 = vector.broadcast %cst_51 : f32 to vector<8x24xf32>
    %51 = arith.maximumf %49, %50 : vector<8x24xf32>
    %c0_52 = arith.constant 0 : index
    %c0_53 = arith.constant 0 : index
    %52 = vector.load %arg6[%c0_52, %c0_53] : memref<8x4xbf16, #tpu.memory_space<vmem>>, vector<8x4xbf16>
    %c0_54 = arith.constant 0 : index
    %c128_55 = arith.constant 128 : index
    %53 = vector.load %arg9[%c0_54, %c128_55] : memref<4x256xbf16, #tpu.memory_space<vmem>>, vector<4x16xbf16>
    %cst_56 = arith.constant dense<0.000000e+00> : vector<8x16xf32>
    %54 = tpu.matmul %52, %53, %cst_56 {dimension_numbers = #tpu.dot_dimension_numbers<[1], [0], [0], [1], [0, 0, 1, 1], [], []>} : vector<8x4xbf16>, vector<4x16xbf16>, vector<8x16xf32> -> vector<8x16xf32>
    %c0_57 = arith.constant 0 : index
    %c0_58 = arith.constant 0 : index
    %55 = vector.load %arg7[%c0_57, %c0_58] : memref<8x1xf32, #tpu.memory_space<vmem>>, vector<8x1xf32>
    %56 = vector.broadcast %55 : vector<8x1xf32> to vector<8x16xf32>
    %57 = arith.addf %54, %56 : vector<8x16xf32>
    %c0_59 = arith.constant 0 : index
    %c0_60 = arith.constant 0 : index
    %58 = vector.load %arg11[%c0_59, %c0_60] : memref<8x24xf32, #tpu.memory_space<vmem>>, vector<8x16xf32>
    tpu.vector_store %arg11[%c0_59, %c0_60], %57 {strides = array<i32>} : memref<8x24xf32, #tpu.memory_space<vmem>>, vector<8x16xf32>,
    %c0_61 = arith.constant 0 : index
    %c0_62 = arith.constant 0 : index
    %59 = vector.load %arg11[%c0_61, %c0_62] : memref<8x24xf32, #tpu.memory_space<vmem>>, vector<8x24xf32>
    %60 = arith.addf %51, %59 : vector<8x24xf32>
    %c0_63 = arith.constant 0 : index
    %c0_64 = arith.constant 0 : index
    %c0_65 = arith.constant 0 : index
    %61 = vector.load %arg8[%c0_63, %c0_64, %c0_65] : memref<1x8x24xf32, #tpu.memory_space<vmem>>, vector<1x8x24xf32>
    %62 = vector.shape_cast %61 : vector<1x8x24xf32> to vector<8x24xf32>
    %63 = vector.shape_cast %60 : vector<8x24xf32> to vector<1x8x24xf32>
    tpu.vector_store %arg8[%c0_63, %c0_64, %c0_65], %63 {strides = array<i32>} : memref<1x8x24xf32, #tpu.memory_space<vmem>>, vector<1x8x24xf32>,
    return
  }
  func.func @transform_0(%arg0: i32) -> (i32, i32, i32) {
    %c0_i32 = arith.constant 0 : i32
    %c0_i32_0 = arith.constant 0 : i32
    %c0_i32_1 = arith.constant 0 : i32
    return %arg0, %c0_i32, %c0_i32_0 : i32, i32, i32
  }
  func.func @transform_1(%arg0: i32) -> (i32, i32, i32) {
    %c0_i32 = arith.constant 0 : i32
    %c0_i32_0 = arith.constant 0 : i32
    %c0_i32_1 = arith.constant 0 : i32
    %c0_i32_2 = arith.constant 0 : i32
    return %c0_i32, %c0_i32_0, %c0_i32_1 : i32, i32, i32
  }
  func.func @transform_2(%arg0: i32) -> (i32, i32) {
    %c0_i32 = arith.constant 0 : i32
    %c0_i32_0 = arith.constant 0 : i32
    %c0_i32_1 = arith.constant 0 : i32
    return %c0_i32, %c0_i32_0 : i32, i32
  }
  func.func @transform_3(%arg0: i32) -> (i32, i32, i32) {
    %c0_i32 = arith.constant 0 : i32
    %c0_i32_0 = arith.constant 0 : i32
    %c0_i32_1 = arith.constant 0 : i32
    %c0_i32_2 = arith.constant 0 : i32
    return %c0_i32, %c0_i32_0, %c0_i32_1 : i32, i32, i32
  }
  func.func @transform_4(%arg0: i32) -> (i32, i32) {
    %c0_i32 = arith.constant 0 : i32
    %c0_i32_0 = arith.constant 0 : i32
    %c0_i32_1 = arith.constant 0 : i32
    return %c0_i32, %c0_i32_0 : i32, i32
  }
  func.func @transform_5(%arg0: i32) -> (i32, i32) {
    %c0_i32 = arith.constant 0 : i32
    %c0_i32_0 = arith.constant 0 : i32
    %c0_i32_1 = arith.constant 0 : i32
    return %c0_i32, %c0_i32_0 : i32, i32
  }
  func.func @transform_6(%arg0: i32) -> (i32, i32) {
    %c0_i32 = arith.constant 0 : i32
    %c0_i32_0 = arith.constant 0 : i32
    %c0_i32_1 = arith.constant 0 : i32
    return %c0_i32, %c0_i32_0 : i32, i32
  }
  func.func @transform_7(%arg0: i32) -> (i32, i32, i32) {
    %c0_i32 = arith.constant 0 : i32
    %c0_i32_0 = arith.constant 0 : i32
    %c0_i32_1 = arith.constant 0 : i32
    return %arg0, %c0_i32, %c0_i32_0 : i32, i32, i32
  }
}

</mosaic_0001>

<bundles_post_ra>
// kernel: tpu_custom_call.1
= control target key start
LH: loop header
LB: loop body
LE: loop exit
PB: predicated region body
PF: predicated region fallthrough
CT: control target
= control target key end

     0   :  { %12 = vsyncpa [#allocation6], 0  ;;  %s904_s0 = inlined_call_operand.vmem [shape: f32[2,4,16], index: 0, kind: input, shape index: {}]   ;;  %s905_s1 = inlined_call_operand.vmem [shape: bf16[3,8,4], index: 1, kind: input, shape index: {}]   ;;  %s906_s2 = inlined_call_operand.vmem [shape: f32[8,1], index: 2, kind: input, shape index: {}]   ;;  %s907_s3 = inlined_call_operand.vmem [shape: bf16[3,8,8], index: 3, kind: input, shape index: {}]   ;;  %s908_s4 = inlined_call_operand.vmem [shape: f32[8,1], index: 4, kind: input, shape index: {}]   ;;  %s909_s5 = inlined_call_operand.vmem [shape: bf16[8,4], index: 5, kind: input, shape index: {}]   ;;  %s910_s6 = inlined_call_operand.vmem [shape: f32[8,1], index: 6, kind: input, shape index: {}]   ;;  %s911_s7 = inlined_call_operand.hbm [shape: f32[2,8,24], index: 7, kind: output, shape index: {}]  }
   0x1   :  { %14 = vsyncpa [#allocation6 + $0x1], 0  ;;  %s763_s24 = smov 0   ;;  %s765_s25 = smov 0  }
   0x2   :  { %s767_s26 = smov 0   ;;  %s769_s27 = smov 0  }
   0x3 LB: > { %s784_s28 = sadd.s32 4294967295, %s717_s27   ;;  %s588_s29 = sadd.s32 4294967294, %s717_s27   ;;  %s717_s27 = sphi %s769_s27, %s917_s27   ;;  %s713_s26 = sphi %s767_s26, %s916_s26   ;;  %s709_s25 = sphi %s765_s25, %s915_s25   ;;  %s705_s24 = sphi %s763_s24, %s914_s24  }
   0x4   : > { %s788_s30 = sadd.s32 1, %s717_s27   ;;  %s179_s8 = sadd.s32 1, %s713_s26 }
   0x5   : > { %s176_s9 = ssub.s32 %s717_s27, %s788_s30  ;;  %p189_p0 = scmp.ne.s32.totalorder %s713_s26, %s709_s25 }
   0x6   : > { %p177_p1 = scmp.eq.s32.totalorder %s176_s9, 0  ;;  %p190_p2 = scmp.eq.s32.totalorder %s784_s28, 1 }
   0x7   : > { %p195_p3 = scmp.ne.s32.totalorder %s709_s25, %s705_s24  ;;  %p196_p4 = scmp.eq.s32.totalorder %s588_s29, 1 }
   0x8   : > { %s799_s10 = scalar_select %p177_p1, %s713_s26, %s179_s8  }
   0x9   : > { %p801_p5 = por %p190_p2, %p189_p0  ;;  %p805_p6 = por %p196_p4, %p195_p3 }
   0xa   : > { %p591_p7 = scmp.ge.s32.totalorder %s717_s27, 1  ;;  %p239_p8 = scmp.lt.s32.totalorder %s717_s27, 3 }
   0xc   : > { %p240_p9 = pnand %p591_p7, %p239_p8 }
   0xd   : > { %p270_p10 = scmp.lt.s32.totalorder (!%p240_p9), %s784_s28, 1  ;;  %s720_s18 = smov (!%p240_p9), 2  }
   0xe   : > { %243 = sbr.rel (%p240_p9) target bundleno = 592 (0x250), region = 48  ;;  %s721_s19 = smov (!%p240_p9), 4  }
   0xf   : > { %s267_s9 = sand.u32 (!%p240_p9), 1, %s709_s25   ;;  %s675_s8 = scalar_lea.hbm (!%p240_p9), %s911_s7, 16 }
  0x13   : > { %vm277_vm0 = vcmask 1042400   ;;  %vm279_vm1 = vcmask 156800   ;;  %v719_v0 = vmov 0   ;;  %s271_s13 = scalar_select %p270_p10, %s784_s28, 1  ;;  %vm283_vm2 = vcmask 123904   ;;  %v375_v11 = vld [vmem:[%s906_s2] sm:$0xff] }
  0x14   : > { %278 = vst.msk [vmem:[#allocation2] sm:$0x3] %vm277_vm0, %v719_v0  ;;  %652 = vset.pattern.permute.xlu2 %v719_v0  ;;  %653 = vset.pattern.permute.xlu0 %v719_v0  ;;  %vm305_vm3 = vcmask 1041408   ;;  %vm301_vm4 = vcmask 31744   ;;  %v597_v10 = vld [vmem:[%s905_s1 + $0x8] sm:$0xf] }
  0x15   : > { %280 = vst.msk [vmem:[#allocation2 + $0x2] sm:$0x3] %vm279_vm1, %v719_v0  ;;  %654 = vset.pattern.permute.xlu1 %v719_v0  ;;  %s593_s14 = sshll.u32 %s271_s13, 2  ;;  %378 = vperm.xlu2 %652, %v375_v11   ;;  %vm299_vm5 = vcmask 15360   ;;  %v594_v17 = vld [vmem:[%s905_s1 + $0x4] sm:$0xf] }
  0x16   : > { %s273_s17 = scalar_lea.vmem %s904_s0, %s593_s14  ;;  %v285_v21 = vld [vmem:[%s905_s1] sm:$0xf]  ;;  %vm385_vm6 = vcmask 191648   ;;  %vm383_vm7 = vcmask 1044448   ;;  %vm388_vm8 = vcmask 158720   ;;  %vm408_vm9 = vcmask 1043456  }
  0x17   : > { %v281_v1 = vld [vmem:[%s273_s17] sm:$0xf]  ;;  %386 = vst.msk [vmem:[#allocation3 + $0x4] sm:$0xf] %vm385_vm6, %v719_v0  ;;  %vm404_vm10 = vcmask 64512   ;;  %vm275_vm11 = vcmask 195712  }
  0x18   : > { %v282_v2 = vpack.c.bf16 %v281_v1, %v281_v1  ;;  %384 = vst.msk [vmem:[#allocation3] sm:$0xf] %vm383_vm7, %v719_v0  ;;  %v480_v43 = vld [vmem:[%s909_s5] sm:$0xf]  ;;  %v602_v44 = vld [vmem:[%s907_s3 + $0x8] sm:$0xf] }
  0x19   : > { %v482_v45 = vld [vmem:[%s910_s6] sm:$0xff]  ;;  %v722_v62 = vmov 0.0   ;;  %vm507_vm12 = vcmask 130048   ;;  %s592_s13 = sshll.u32 %s267_s9, 3  ;;  %s606_s14 = sshll.u32 %s784_s28, 3  ;;  %vm511_vm13 = vcmask 195584  }
  0x1a   : > { %284 = vst.msk [vmem:[#allocation2 + $0x2] sm:$0x3] %vm283_vm2, %v282_v2  ;;  %v472_v46 = vld [vmem:[%s908_s4] sm:$0xff]  ;;  %s524_s17 = scalar_lea.hbm %s911_s7, %s606_s14  ;;  %s269_s20 = scalar_lea.vmem [#allocation5], %s592_s13 }
  0x1b   : > { %v599_v55 = vld [vmem:[%s907_s3 + $0x4] sm:$0xf]  ;;  %v390_v56 = vld [vmem:[%s907_s3] sm:$0xf]  ;;  %276 = vst.msk [vmem:[#allocation4] sm:$0xff] %vm275_vm11, %v722_v62  ;;  %s526_s21 = sshll.u32 %s269_s20, 4  ;;  %s527_s21 = int_to_ptr.vmem [resolvable:$true] %s526_s21 }
  0x1c   : > { %s514_s28 = scalar_lea.sflag [#allocation6], %s267_s9 }
  0x21   : > { %v286_v3 = vld [vmem:[#allocation2] sm:$0xf] }
  0x22   : > { %290 = vst [vmem:[#allocation1] ss:$4 sm:$0xff] %v286_v3  ;;  %v354_v8 = vld [vmem:[#allocation2 + $0x2] sm:$0x3] }
  0x23   : > { %v359_v9 = vsel %vm305_vm3, %v354_v8, 0  ;;  %v481_v41 = vld [vmem:[#allocation2 + $0x2] sm:$0x3] }
  0x24   : > { %368 = vmatpush.bf16.msra.mxu2 %v359_v9  ;;  %v492_v42 = vsel %vm305_vm3, %v481_v41, 0 }
  0x27   : > { %598 = vmatmul.msk.bf16.vlgmr.msra.gmra.mxu2 %vm301_vm4, %v597_v10 }
  0x28   : > { %501 = vmatpush.bf16.msrb.mxu2 %v492_v42 }
  0x29   : > { %v291_v4 = vld.sshfl [vmem:[#allocation1] sm:$0xff pattern:$0x73625140]  ;;  %v293_v5 = vld.sshfl [vmem:[#allocation1 + $0x8] sm:$0xff pattern:$0x73625140] }
  0x2a   : > { %295 = vrot.lane.b32.xlu0 %v291_v4, %s720_s18  ;;  %322 = vst [vmem:[#allocation1] ss:$4 sm:$0xff] %v286_v3 }
  0x31   : > { %v323_v6 = vld.sshfl [vmem:[#allocation1] sm:$0xff pattern:$0x73625140]  ;;  %v325_v7 = vld.sshfl [vmem:[#allocation1 + $0x8] sm:$0xff pattern:$0x73625140] }
  0x32   : > { %297 = vrot.lane.b32.xlu0 %v293_v5, %s720_s18  ;;  %327 = vrot.lane.b32.xlu1 %v323_v6, %s721_s19 }
  0x37   : > { %604 = vmatmul.msk.bf16.vlgmr.msrb.gmra.mxu2 %vm301_vm4, %v480_v43 }
  0x3a   : > { %329 = vrot.lane.b32.xlu1 %v325_v7, %s721_s19 }
  0x6f   : > { %v379_v28 = vpop.permute.xlu2 %378 }
  0x9c   : > { %v296_v12 = vpop.permute.xlu0 %295 }
  0xa4   : > { %v298_v13 = vpop.permute.xlu0 %297  ;;  %v328_v14 = vpop.permute.xlu1 %327 }
  0xa5   : > { %v300_v15 = vsel %vm299_vm5, %v296_v12, %v298_v13 }
  0xa6   : > { %v307_v16 = vsel %vm305_vm3, %v300_v15, 0 }
  0xa7   : > { %316 = vmatpush.bf16.msra.mxu0 %v307_v16 }
  0xaa   : > { %595 = vmatmul.msk.bf16.vlgmr.msra.gmra.mxu0 %vm301_vm4, %v594_v17  ;;  %v370_v22 = vpop.f32.mrf.mxu2 }
  0xac   : > { %v330_v18 = vpop.permute.xlu1 %329 }
  0xad   : > { %v332_v19 = vsel %vm301_vm4, %v328_v14, %v330_v18 }
  0xae   : > { %v337_v20 = vsel %vm305_vm3, %v332_v19, 0 }
  0xaf   : > { %346 = vmatpush.bf16.msra.mxu1 %v337_v20 }
  0xb2   : > { %596 = vmatmul.msk.bf16.vlgmr.msra.gmra.mxu1 %vm301_vm4, %v285_v21  ;;  %v372_v23 = vpop.f32.mrf.mxu2 }
  0xba   : > { %v503_v57 = vpop.f32.mrf.mxu2 }
  0xc2   : > { %v505_v59 = vpop.f32.mrf.mxu2 }
 0x127   : > { %v318_v24 = vpop.f32.mrf.mxu0 }
 0x12f   : > { %v320_v25 = vpop.f32.mrf.mxu0  ;;  %v348_v26 = vpop.f32.mrf.mxu1 }
 0x130   : > { %v349_v27 = vadd.f32 %v348_v26, %v318_v24 }
 0x132   : > { %v374_v29 = vadd.f32 %v370_v22, %v349_v27 }
 0x134   : > { %v381_v30 = vadd.f32 %v379_v28, %v374_v29 }
 0x136   : > { %v382_v31 = vmax.f32 %v381_v30, 0.0 }
 0x137   : > { %v350_v32 = vpop.f32.mrf.mxu1 }
 0x138   : > { %v387_v33 = vpack.c.bf16 %v382_v31, %v382_v31 }
 0x13a   : > { %389 = vst.msk [vmem:[#allocation3 + $0x4] sm:$0xf] %vm388_vm8, %v387_v33 }
 0x141   : > { %v451_v34 = vld [vmem:[#allocation3 + $0x4] sm:$0xf] }
 0x142   : > { %v391_v35 = vld [vmem:[#allocation3] sm:$0xff]  ;;  %v456_v36 = vsel %vm408_vm9, %v451_v34, 0 }
 0x143   : > { %v396_v37 = vunpack.c.h.b16 %v391_v35  ;;  %v395_v38 = vunpack.c.l.b16 %v391_v35  ;;  %465 = vmatpush.bf16.msrb.mxu1 %v456_v36 }
 0x145   : > { %v398_v39 = vpack.c.b16 %v396_v37, %v396_v37  ;;  %v397_v40 = vpack.c.b16 %v395_v38, %v395_v38 }
 0x146   : > { %603 = vmatmul.msk.bf16.vlgmr.msrb.gmra.mxu1 %vm404_vm10, %v602_v44 }
 0x147   : > { %401 = vrot.lane.b32.xlu0 %v398_v39, %s720_s18  ;;  %425 = vrot.lane.b32.xlu1 %v397_v40, %s721_s19 }
 0x148   : > { %399 = vrot.lane.b32.xlu2 %v397_v40, %s720_s18  ;;  %s528_s18 = sshll.u32 %s524_s17, 4  ;;  %s529_s18 = int_to_ptr.hbm [resolvable:$true] %s528_s18 }
 0x14f   : > { %485 = vperm.xlu0 %653, %v482_v45   ;;  %475 = vperm.xlu1 %654, %v472_v46  }
 0x150   : > { %427 = vrot.lane.b32.xlu2 %v398_v39, %s721_s19  ;;  %s669_s19 = sshra.s32 %s529_s18, 4  ;;  %s670_s19 = int_to_ptr.hbm [resolvable:$true] %s669_s19 }
 0x151   : > { %s671_s22 = scalar_lea.hbm %s670_s19, 8  ;;  %p676_p0 = scmp.lt.s32.totalorder %s670_s19, %s911_s7 }
 0x152   : > { %p672_p11 = scmp.ne.s32.totalorder %s670_s19, %s671_s22  ;;  %p677_p1 = scmp.lt.s32.totalorder %s675_s8, %s671_s22 }
 0x154   : > { %p673_p12 = pnand %p672_p11, %p801_p5  ;;  %p678_p2 = por %p677_p1, %p676_p0 }
 0x156   : > { %p674_p13 = pneg %p673_p12 }
 0x158   : > { %p679_p3 = pnand %p678_p2, %p674_p13 }
 0x1a2   : > { %v400_v47 = vpop.permute.xlu2 %399 }
 0x1aa   : > { %v428_v48 = vpop.permute.xlu2 %427 }
 0x1b9   : > { %v402_v49 = vpop.permute.xlu0 %401  ;;  %v426_v50 = vpop.permute.xlu1 %425 }
 0x1ba   : > { %v403_v51 = vsel %vm299_vm5, %v400_v47, %v402_v49  ;;  %v429_v52 = vsel %vm301_vm4, %v426_v50, %v428_v48 }
 0x1bb   : > { %v410_v53 = vsel %vm408_vm9, %v403_v51, 0  ;;  %v434_v54 = vsel %vm408_vm9, %v429_v52, 0 }
 0x1bc   : > { %419 = vmatpush.bf16.msra.mxu3 %v410_v53  ;;  %443 = vmatpush.bf16.msrb.mxu0 %v434_v54 }
 0x1bf   : > { %600 = vmatmul.msk.bf16.vlgmr.msra.gmra.mxu3 %vm404_vm10, %v599_v55  ;;  %601 = vmatmul.msk.bf16.vlgmr.msrb.gmra.mxu0 %vm404_vm10, %v390_v56 }
 0x1c1   : > { %v486_v60 = vpop.permute.xlu0 %485  ;;  %v476_v4 = vpop.permute.xlu1 %475 }
 0x1c2   : > { %v504_v61 = vadd.f32 %v503_v57, %v486_v60 }
 0x1c3   : > { %v467_v58 = vpop.f32.mrf.mxu1 }
 0x1c4   : > { %508 = vst.msk [vmem:[#allocation4] sm:$0xff] %vm507_vm12, %v504_v61 }
 0x1cb   : > { %v469_v63 = vpop.f32.mrf.mxu1  ;;  %v509_v7 = vld [vmem:[#allocation4] sm:$0xff] }
 0x23c   : > { %v445_v0 = vpop.f32.mrf.mxu0 }
 0x242   : > { %v421_v1 = vpop.f32.mrf.mxu3 }
 0x243   : > { %v446_v2 = vadd.f32 %v445_v0, %v421_v1 }
 0x244   : > { %v447_v3 = vpop.f32.mrf.mxu0 }
 0x245   : > { %v471_v5 = vadd.f32 %v467_v58, %v446_v2 }
 0x247   : > { %v478_v6 = vadd.f32 %v476_v4, %v471_v5 }
 0x249   : > { %v479_v8 = vmax.f32 %v478_v6, 0.0 }
 0x24a   : > { %v423_v9 = vpop.f32.mrf.mxu3 }
 0x24b   : > { %v510_v10 = vadd.f32 %v509_v7, %v479_v8 }
 0x24d   : > { %512 = vst.msk [vmem:[%s269_s20] sm:$0xff] %vm511_vm13, %v510_v10 }
 0x24e   : > { %682 = shalt.err (!%p679_p3)
}
 0x24f   : > { %609 = dma.vmem_to_hbm [thread:$0]  (%p801_p5), %s527_s21, 128, %s529_s18, %s514_s28  }
 0x250 PF: > { %p615_p4 = scmp.ge.s32.totalorder %s717_s27, 2  ;;  %s540_s9 = sand.u32 1, %s705_s24  }
 0x251   : > { %s541_s15 = scalar_lea.sflag [#allocation6], %s540_s9 }
 0x252   : > { %p612_p7 = pnand %p615_p4, %p805_p6 }
 0x254   : > { %p613_p8 = pneg %p612_p7 }
 0x256   : > { %700 = dma.done.wait (%p613_p8), %s541_s15, 128  }
 0x257   : > { %702 = vsyncadd (%p613_p8), %s541_s15, 4294967168  ;;  %p17_p9 = scmp.ge.s32.totalorder %s788_s30, 4   ;;  %s914_s24 = smov %s709_s25 }
 0x258   : > { %s915_s25 = smov %s713_s26  ;;  %s916_s26 = smov %s799_s10 }
 0x259   : > { %s917_s27 = smov %s788_s30  ;;  %19 = sbr.rel (!%p17_p9) target bundleno = 3 (0x3), region = 87 }
 0x25e   :  { %547 = vsyncpa [#allocation6], 1 }
 0x25f   :  { %549 = vsyncpa [#allocation6 + $0x1], 1 }

</bundles_post_ra>
